<compile_context>
chip_gen: v7x
topology: tpu7x:2x2x1
jax: 0.10.0
libtpu: 0.0.40
codegen_flags: <defaults>
</compile_context>

<pallas_src>
import jax
import jax.numpy as jnp
from jax.experimental import pallas as pl
from jax.experimental.pallas import tpu as pltpu

_LANE = 128
_SUBLANE = 8

# Tile-planning knobs (conservative so the double-buffered footprint stays well under
# the 64 MiB physical VMEM of v7x; v5e/v6e have more headroom).
_RESIDENT_W_BYTES = 4 * 1024 * 1024   # keep weight VMEM-resident below this size
_MAX_RESIDENT_N = 2048                # ... and only if Np / K are modest, so the
_MAX_RESIDENT_K = 4096                #     x / out tiles also stay small
_MAX_SINGLE_K = 2048                  # above this, tile (and if needed pad) K


def _round_up(v, m):
    return ((v + m - 1) // m) * m


# --------------------------------------------------------------------------- kernels
def _ndim_linear_kernel_single_k(x_ref, w_ref, b_ref, o_ref):
    """Single K block: no accumulator scratch, write the tile directly."""
    acc = jnp.dot(x_ref[...], w_ref[...], preferred_element_type=jnp.float32)
    o_ref[...] = (acc + b_ref[...]).astype(o_ref.dtype)


def _ndim_linear_kernel_multi_k(x_ref, w_ref, b_ref, o_ref, acc_ref):
    """K-tiled reduction: f32 VMEM accumulator, init/finalize via pl.when."""
    k = pl.program_id(2)

    @pl.when(k == 0)
    def _():
        acc_ref[...] = jnp.zeros_like(acc_ref)

    acc_ref[...] += jnp.dot(x_ref[...], w_ref[...],
                            preferred_element_type=jnp.float32)

    @pl.when(k == pl.num_programs(2) - 1)
    def _():
        o_ref[...] = (acc_ref[...] + b_ref[...]).astype(o_ref.dtype)


# --------------------------------------------------------------------- tile planning
def _plan_nk(K, Np, itemsize):
    """Return (Kp, tk, tn). Decided once at parameter-prep time (M-independent)."""
    w_bytes = K * Np * itemsize
    if (w_bytes <= _RESIDENT_W_BYTES and Np <= _MAX_RESIDENT_N
            and K <= _MAX_RESIDENT_K):
        # Weight fully VMEM-resident: single N block, single K block -> its block
        # index is constant across the M grid axis and it is DMA'd only once.
        return K, K, Np

    # N tiling: largest lane-multiple that divides Np (Np is a multiple of 128).
    tn = 128
    for c in (512, 256):
        if Np % c == 0:
            tn = c
            break

    if K <= _MAX_SINGLE_K:
        return K, K, tn          # single K block (full-dim block is always legal)

    # Large K: pad to a multiple of 512 (exact for a contraction) and tile it, so
    # tiles never blow past the scoped VMEM limit on any generation.
    Kp = K if K % 512 == 0 else _round_up(K, 512)
    tk = 512
    for c in (2048, 1024):
        if Kp % c == 0:
            tk = c
            break
    return Kp, tk, tn


def _make_x_spec_single_k(tm, kp, multi_buffer):
    idx = lambda i, j: (i, 0)
    if multi_buffer and hasattr(pl, "Buffered"):
        try:
            # Memory-bound shapes: a 3-deep activation pipeline hides DMA latency.
            return pl.BlockSpec((tm, kp), idx, pipeline_mode=pl.Buffered(3))
        except Exception:
            pass
    return pl.BlockSpec((tm, kp), idx)


# ------------------------------------------------------------------- parameter prep
def prepare_ndim_linear_params(weight, bias=None, *, compute_dtype=jnp.bfloat16):
    """One-time weight/bias preparation (hoist out of the per-forward path).

    weight : (out_features, in_features)  (PyTorch nn.Linear convention)
    bias   : (out_features,) or None
    compute_dtype : MXU operand dtype. Default bfloat16 (f32 accumulate). Use
                    jnp.float32 for exactness, or an fp8 dtype on v7x where model
                    accuracy allows (int8 is NOT an MXU dtype on v7x).
    """
    weight = jnp.asarray(weight)
    N, K = weight.shape
    Np = _round_up(N, _LANE)
    compute_dtype = jnp.dtype(compute_dtype)
    Kp, tk, tn = _plan_nk(K, Np, compute_dtype.itemsize)

    # Transpose once so the kernel runs a standard (tm,tk)x(tk,tn) matmul (no per-tile
    # XLU transpose stealing the MXU's vector-extended issue slots).
    w_t = weight.T.astype(compute_dtype)                      # (K, N)
    pad_k, pad_n = Kp - K, Np - N
    if pad_k or pad_n:
        w_t = jnp.pad(w_t, ((0, pad_k), (0, pad_n)))          # zeros: exact

    if bias is None:
        b2 = jnp.zeros((1, Np), jnp.float32)
    else:
        b2 = jnp.asarray(bias).astype(jnp.float32).reshape(1, N)
        if pad_n:
            b2 = jnp.pad(b2, ((0, 0), (0, pad_n)))

    return {"w_t": w_t, "b2": b2, "n": N, "k": K, "kp": Kp, "tk": tk, "tn": tn,
            "compute_dtype": compute_dtype}


# ------------------------------------------------------------------------ forward
def ndim_linear_prepared(x, params):
    """Pallas equivalent of NDimLinear.forward using pre-prepared parameters."""
    w_t, b2 = params["w_t"], params["b2"]
    N, K, Kp = params["n"], params["k"], params["kp"]
    tk, tn = params["tk"], params["tn"]
    cd = params["compute_dtype"]
    Np = w_t.shape[1]

    # Mirror the PyTorch view logic: always flatten to (-1, in_features).
    *lead, _ = x.shape
    x2 = x.reshape(-1, K).astype(cd)
    M = x2.shape[0]
    if Kp != K:
        x2 = jnp.pad(x2, ((0, 0), (0, Kp - K)))               # zeros: exact

    # Large M tile for MXU utilization; a full-dim block is always legal for small M.
    tm = 256 if M >= 256 else M
    n_m = pl.cdiv(M, tm)
    n_n = Np // tn
    n_k = Kp // tk
    resident = (n_n == 1 and n_k == 1)

    out_dtype = x.dtype
    os_ = jnp.dtype(out_dtype).itemsize
    cs = cd.itemsize

    # Traffic-accurate cost estimate under the chosen tiling (weight re-streamed per
    # M tile only when it is not VMEM-resident; activations re-read per N tile).
    x_bytes = M * Kp * cs * n_n
    w_bytes = Kp * Np * cs * (1 if resident else n_m)
    cost = pl.CostEstimate(
        flops=2 * M * Kp * Np,
        transcendentals=0,
        bytes_accessed=int(x_bytes + w_bytes + Np * 4 + M * Np * os_),
    )

    if n_k == 1:
        # Single K step: bypass the accumulator entirely (no scratch, no zero-init,
        # no f32 read-add-write per tile).
        multi_buffer = resident and n_m >= 3
        grid = (n_m, n_n)
        in_specs = [
            _make_x_spec_single_k(tm, Kp, multi_buffer),          # activations
            pl.BlockSpec((Kp, tn), lambda i, j: (0, j)),          # weight (resident
            pl.BlockSpec((1, tn), lambda i, j: (0, j)),           #  when n_n == 1)
        ]
        out_specs = pl.BlockSpec((tm, tn), lambda i, j: (i, j))
        scratch = []
        kernel = _ndim_linear_kernel_single_k
        dims = ("parallel", "parallel")
        nbuf_x = 3 if multi_buffer else 2
    else:
        grid = (n_m, n_n, n_k)
        in_specs = [
            pl.BlockSpec((tm, tk), lambda i, j, k: (i, k)),       # activation tile
            pl.BlockSpec((tk, tn), lambda i, j, k: (k, j)),       # weight tile (K, N)
            pl.BlockSpec((1, tn), lambda i, j, k: (0, j)),        # f32 bias row
        ]
        out_specs = pl.BlockSpec((tm, tn), lambda i, j, k: (i, j))
        scratch = [pltpu.VMEM((tm, tn), jnp.float32)]
        kernel = _ndim_linear_kernel_multi_k
        dims = ("parallel", "parallel", "arbitrary")
        nbuf_x = 2

    # Explicit scoped-VMEM budget from the actual buffer footprint (double-buffered
    # weight/bias/out, nbuf_x-buffered activations, f32 accumulator if K is tiled).
    foot = (nbuf_x * tm * tk * cs + 2 * tk * tn * cs + 2 * tn * 4
            + 2 * tm * tn * os_ + (tm * tn * 4 if n_k > 1 else 0))
    vmem_limit = int(min(48 * 1024 * 1024, max(32 * 1024 * 1024, 2 * foot)))

    out = pl.pallas_call(
        kernel,
        out_shape=jax.ShapeDtypeStruct((M, Np), out_dtype),
        grid_spec=pltpu.PrefetchScalarGridSpec(
            num_scalar_prefetch=0,
            grid=grid,
            in_specs=in_specs,
            out_specs=out_specs,
            scratch_shapes=scratch,
        ),
        compiler_params=pltpu.CompilerParams(
            dimension_semantics=dims,
            vmem_limit_bytes=vmem_limit,
        ),
        cost_estimate=cost,
    )(x2, w_t, b2)

    if Np != N:
        # Padded out_features columns are exact zeros; dropping them here is one extra
        # XLA pass over the output — keep the padded width through the consumer where
        # the surrounding graph allows.
        out = out[:, :N]
    return out.reshape(*lead, -1)


def ndim_linear(x, weight, bias=None, *, compute_dtype=jnp.bfloat16):
    """Convenience wrapper: prepares parameters per call. For repeated forwards,
    call prepare_ndim_linear_params once and reuse it with ndim_linear_prepared."""
    params = prepare_ndim_linear_params(weight, bias, compute_dtype=compute_dtype)
    return ndim_linear_prepared(x, params)


def init_linear_params(key, in_features, out_features, dtype=jnp.float32):
    """Deterministic init matching nn.Linear's default (kaiming-uniform-ish)."""
    kw, kb = jax.random.split(key)
    bound = 1.0 / (in_features ** 0.5)
    weight = jax.random.uniform(
        kw, (out_features, in_features), dtype=dtype, minval=-bound, maxval=bound
    )
    bias = jax.random.uniform(
        kb, (out_features,), dtype=dtype, minval=-bound, maxval=bound
    )
    return weight, bias


if __name__ == "__main__":
    key = jax.random.PRNGKey(0)
    k_x, k_p, k_x2, k_p2 = jax.random.split(key, 4)

    # --- Case 1: typical shapes, default bf16 MXU operands, hoisted param prep. ---
    in_features, out_features = 32, 64
    x = jax.random.normal(k_x, (2, 4, 8, in_features), dtype=jnp.float32)
    weight, bias = init_linear_params(k_p, in_features, out_features)

    params = prepare_ndim_linear_params(weight, bias)          # done once, reused
    y = jax.block_until_ready(ndim_linear_prepared(x, params))

    ref = (jnp.dot(x.reshape(-1, in_features).astype(jnp.bfloat16),
                   weight.T.astype(jnp.bfloat16),
                   preferred_element_type=jnp.float32)
           + bias.astype(jnp.float32)).reshape(2, 4, 8, out_features)
    assert y.shape == (2, 4, 8, out_features), y.shape
    assert jnp.allclose(y, ref, atol=5e-3, rtol=5e-3), float(jnp.max(jnp.abs(y - ref)))

    # --- Case 2: ragged shapes (M not a multiple of 8, N not a multiple of 128),
    #     exact f32 compute path. ---
    in2, out2 = 48, 72
    x_b = jax.random.normal(k_x2, (2, 3, 5, in2), dtype=jnp.float32)
    w_b, b_b = init_linear_params(k_p2, in2, out2)
    y_b = jax.block_until_ready(
        ndim_linear(x_b, w_b, b_b, compute_dtype=jnp.float32))
    ref_b = (x_b.reshape(-1, in2) @ w_b.T + b_b).reshape(2, 3, 5, out2)
    assert y_b.shape == (2, 3, 5, out2), y_b.shape
    assert jnp.allclose(y_b, ref_b, atol=1e-5, rtol=1e-5), float(
        jnp.max(jnp.abs(y_b - ref_b)))

    print("KERNEL_OK")
</pallas_src>

<mosaic_0001>
module attributes {stable_mosaic.version = 11 : i64} {
  func.func @_ndim_linear_kernel_single_k(%arg0: i32, %arg1: i32, %arg2: memref<64x32xbf16, #tpu.memory_space<vmem>>, %arg3: memref<32x128xbf16, #tpu.memory_space<vmem>>, %arg4: memref<1x128xf32, #tpu.memory_space<vmem>>, %arg5: memref<64x128xf32, #tpu.memory_space<vmem>>) attributes {dimension_semantics = [#tpu.dimension_semantics<parallel>, #tpu.dimension_semantics<parallel>], iteration_bounds = array<i64: 1, 1>, scalar_prefetch = 0 : i64, scratch_operands = 0 : i64, tpu.core_type = #tpu.core_type<tc>, window_params = [{transform_indices = @transform_0, window_bounds = array<i64: 64, 32>}, {transform_indices = @transform_1, window_bounds = array<i64: 32, 128>}, {transform_indices = @transform_2, window_bounds = array<i64: 1, 128>}, {transform_indices = @transform_3, window_bounds = array<i64: 64, 128>}]} {
    %c0 = arith.constant 0 : index
    %c0_0 = arith.constant 0 : index
    %0 = vector.load %arg2[%c0, %c0_0] : memref<64x32xbf16, #tpu.memory_space<vmem>>, vector<64x32xbf16>
    %c0_1 = arith.constant 0 : index
    %c0_2 = arith.constant 0 : index
    %1 = vector.load %arg3[%c0_1, %c0_2] : memref<32x128xbf16, #tpu.memory_space<vmem>>, vector<32x128xbf16>
    %cst = arith.constant dense<0.000000e+00> : vector<64x128xf32>
    %2 = tpu.matmul %0, %1, %cst {dimension_numbers = #tpu.dot_dimension_numbers<[1], [0], [0], [1], [0, 0, 1, 1], [], []>} : vector<64x32xbf16>, vector<32x128xbf16>, vector<64x128xf32> -> vector<64x128xf32>
    %c0_3 = arith.constant 0 : index
    %c0_4 = arith.constant 0 : index
    %3 = vector.load %arg4[%c0_3, %c0_4] : memref<1x128xf32, #tpu.memory_space<vmem>>, vector<1x128xf32>
    %4 = vector.broadcast %3 : vector<1x128xf32> to vector<64x128xf32>
    %5 = arith.addf %2, %4 : vector<64x128xf32>
    %c0_5 = arith.constant 0 : index
    %c0_6 = arith.constant 0 : index
    %6 = vector.load %arg5[%c0_5, %c0_6] : memref<64x128xf32, #tpu.memory_space<vmem>>, vector<64x128xf32>
    tpu.vector_store %arg5[%c0_5, %c0_6], %5 {strides = array<i32>} : memref<64x128xf32, #tpu.memory_space<vmem>>, vector<64x128xf32>,
    return
  }
  func.func @transform_0(%arg0: i32, %arg1: i32) -> (i32, i32) {
    %c0_i32 = arith.constant 0 : i32
    %c0_i32_0 = arith.constant 0 : i32
    return %arg0, %c0_i32 : i32, i32
  }
  func.func @transform_1(%arg0: i32, %arg1: i32) -> (i32, i32) {
    %c0_i32 = arith.constant 0 : i32
    %c0_i32_0 = arith.constant 0 : i32
    return %c0_i32, %arg1 : i32, i32
  }
  func.func @transform_2(%arg0: i32, %arg1: i32) -> (i32, i32) {
    %c0_i32 = arith.constant 0 : i32
    %c0_i32_0 = arith.constant 0 : i32
    return %c0_i32, %arg1 : i32, i32
  }
  func.func @transform_3(%arg0: i32, %arg1: i32) -> (i32, i32) {
    %c0_i32 = arith.constant 0 : i32
    return %arg0, %arg1 : i32, i32
  }
}

</mosaic_0001>

<bundles_post_ra>
// kernel: tpu_custom_call.1
= control target key start
LH: loop header
LB: loop body
LE: loop exit
PB: predicated region body
PF: predicated region fallthrough
CT: control target
= control target key end

     0   :  { %vm67_vm0 = vcmask 261120   ;;  %s291_s0 = inlined_call_operand.vmem [shape: bf16[64,32], index: 0, kind: input, shape index: {}]   ;;  %s292_s1 = inlined_call_operand.vmem [shape: bf16[32,128], index: 1, kind: input, shape index: {}]   ;;  %s293_s2 = inlined_call_operand.vmem [shape: f32[1,128], index: 2, kind: input, shape index: {}]   ;;  %s294_s3 = inlined_call_operand.hbm [shape: f32[64,128], index: 3, kind: output, shape index: {}]  }
   0x1   :  { %v205_v0 = vld [vmem:[%s292_s1] sm:$0xff]   ;;  %v206_v1 = vld [vmem:[%s292_s1 + $0x8] sm:$0xff]   ;;  %v208_v3 = vld [vmem:[%s291_s0 + $0x10] sm:$0xff]  }
   0x2   :  { %186 = vmatprep.subr.bf16.mxu0 %v205_v0  ;;  %198 = vmatprep.subr.bf16.mxu1 %v205_v0  ;;  %v207_v2 = vld [vmem:[%s291_s0] sm:$0xff]   ;;  %v209_v4 = vld [vmem:[%s291_s0 + $0x8] sm:$0xff]   ;;  %v210_v5 = vld [vmem:[%s291_s0 + $0x18] sm:$0xff]  }
   0x3   :  { %187 = vmatpush3.bf16.msra.mxu0 %v205_v0  ;;  %200 = vmatpush3.bf16.msra.mxu1 %v205_v0 }
   0x4   :  { %188 = vmatprep.subr.bf16.mxu0 %v206_v1  ;;  %199 = vmatprep.subr.bf16.mxu1 %v206_v1 }
   0x5   :  { %190 = vmatprep.mubr.msk.bf16.mxu0 %vm67_vm0, %v207_v2  ;;  %194 = vmatprep.mubr.msk.bf16.mxu1 %vm67_vm0, %v208_v3 }
   0x6   :  { %8 = vsyncpa [#allocation3], 0  ;;  %v169_v6 = vld [vmem:[%s293_s2] ss:$0 sm:$0xff]  ;;  %s235_s25 = smov [#allocation2]  }
   0x7   :  { %189 = vmatpush3.bf16.msra.mxu0 %v206_v1  ;;  %201 = vmatpush3.bf16.msra.mxu1 %v206_v1  ;;  %s158_s26 = sshll.u32 %s235_s25, 4  ;;  %s159_s26 = int_to_ptr.vmem [resolvable:$true] %s158_s26 }
   0x8   :  { %s211_s0 = scalar_lea.vmem %s159_s26, 1024  ;;  %p216_p1 = scmp.lt.s32.totalorder %s159_s26, %s159_s26 }
   0x9   :  { %p212_p0 = scmp.ne.s32.totalorder %s159_s26, %s211_s0  ;;  %p217_p2 = scmp.lt.s32.totalorder %s211_s0, %s211_s0 }
   0xa   :  { %191 = vmatmul.mubr.msk.bf16.vlgmr.msra.gmra.mrb[0].mxu0 %vm67_vm0, %v209_v4  ;;  %195 = vmatmul.mubr.msk.bf16.vlgmr.msra.gmra.mrb[0].mxu1 %vm67_vm0, %v210_v5 }
   0xb   :  { %p218_p3 = por %p217_p2, %p216_p1 }
   0xd   :  { %p219_p4 = pnand %p218_p3, %p212_p0 }
  0xdd   :  { %v192_v7 = vpop.f32.mrb[0].mxu0  ;;  %v196_v8 = vpop.f32.mrb[0].mxu1 }
  0xde   :  { %v123_v9 = vadd.f32 %v192_v7, %v169_v6  ;;  %v139_v10 = vadd.f32 %v196_v8, %v169_v6  ;;  %v114_v11 = vpop.f32.mrb[1].mxu0  ;;  %v130_v12 = vpop.f32.mrb[1].mxu1 }
  0xdf   :  { %v115_v13 = vadd.f32 %v169_v6, %v114_v11  ;;  %v131_v14 = vadd.f32 %v169_v6, %v130_v12  ;;  %v193_v15 = vpop.f32.mrb[2].mxu0  ;;  %v197_v16 = vpop.f32.mrb[2].mxu1 }
  0xe0   :  { %147 = vst [vmem:[#allocation2 + $0x10] sm:$0xff] %v123_v9  ;;  %151 = vst [vmem:[#allocation2 + $0x30] sm:$0xff] %v139_v10  ;;  %v126_v17 = vadd.f32 %v193_v15, %v169_v6  ;;  %v142_v18 = vadd.f32 %v197_v16, %v169_v6  ;;  %v117_v19 = vpop.f32.mrb[3].mxu0  ;;  %v133_v20 = vpop.f32.mrb[3].mxu1 }
  0xe1   :  { %145 = vst [vmem:[#allocation2] sm:$0xff] %v115_v13  ;;  %149 = vst [vmem:[#allocation2 + $0x20] sm:$0xff] %v131_v14  ;;  %v118_v21 = vadd.f32 %v169_v6, %v117_v19  ;;  %v134_v22 = vadd.f32 %v169_v6, %v133_v20 }
  0xe2   :  { %148 = vst [vmem:[#allocation2 + $0x18] sm:$0xff] %v126_v17  ;;  %152 = vst [vmem:[#allocation2 + $0x38] sm:$0xff] %v142_v18 }
  0xe3   :  { %146 = vst [vmem:[#allocation2 + $0x8] sm:$0xff] %v118_v21  ;;  %150 = vst [vmem:[#allocation2 + $0x28] sm:$0xff] %v134_v22 }
  0xe4   :  { %222 = shalt.err (!%p219_p4)
}
  0xe5   :  { %s223_s28 = scalar_lea.hbm %s294_s3, 1024 }
  0xe6   :  { %p224_p5 = scmp.ne.s32.totalorder %s294_s3, %s223_s28  ;;  %p227_p6 = scmp.lt.u32.totalorder %s223_s28, %s294_s3 }
  0xe8   :  { %p229_p7 = pnand %p227_p6, %p224_p5 }
  0xea   :  { %232 = shalt.err (!%p229_p7)
}
  0xeb   :  { %s236_s6 = smov 128   ;;  %s237_s7 = smov 8  }
  0xec   :  { %164 = dma.vmem_to_hbm [thread:$0]  %s159_s26, 1024, %s294_s3, [#allocation3], %s236_s6, %s236_s6, %s237_s7  }
  0xed   :  { %233 = dma.done.wait [#allocation3], 1024  }
  0xee   :  { %234 = vsyncadd [#allocation3], 4294966272 }
  0xef   :  { %168 = vsyncpa [#allocation3], 1 }

</bundles_post_ra>
